<compile_context>
chip_gen: v7x
topology: tpu7x:2x2x1
jax: 0.10.0
libtpu: 0.0.40
codegen_flags: <defaults>
</compile_context>

<pallas_src>
import functools

import jax
import jax.numpy as jnp
from jax.experimental import pallas as pl
from jax.experimental.pallas import tpu as pltpu


def _round_up(x, m):
    return ((x + m - 1) // m) * m


def clip_ft_kernel(pooled_ref, w_emb_ref, b_emb_ref, ln_g_ref, ln_b_ref,
                   w_fused_ref, b_cls_ref, out_ref, *, h_true, h_pad):
    """Fused: patch-embed matmul -> LayerNorm -> (proj @ classifier) matmul."""
    # Patch embedding on the pooled patch.  [Bt, Dp_p] bf16 x [Dp_p, H_p] bf16.
    emb = jnp.dot(pooled_ref[...], w_emb_ref[...],
                  preferred_element_type=jnp.float32)              # [Bt, H_p] f32
    emb = emb + b_emb_ref[...]                                     # padded cols stay 0

    # LayerNorm over the TRUE hidden width.  Padded columns of `emb` are exactly
    # zero, so the mean needs only the /h_true fix and the variance a
    # -n_pad*mu^2 correction (clamped to avoid negative variance from cancellation).
    n_pad = h_pad - h_true
    inv_h = 1.0 / float(h_true)
    mu = jnp.sum(emb, axis=-1, keepdims=True) * inv_h
    d = emb - mu
    var = (jnp.sum(d * d, axis=-1, keepdims=True) - float(n_pad) * mu * mu) * inv_h
    var = jnp.maximum(var, 0.0)
    normed = d * jax.lax.rsqrt(var + 1e-5)
    normed = normed * ln_g_ref[...] + ln_b_ref[...]                # padded cols -> 0

    # Fused visual projection + classifier (single lane-dense MXU matmul).
    logits = jnp.dot(normed.astype(jnp.bfloat16), w_fused_ref[...],
                     preferred_element_type=jnp.float32)           # [Bt, C_p] f32
    out_ref[...] = (logits + b_cls_ref[...]).astype(out_ref.dtype)


def clip_finetuner_forward(pixel_values, params, patch_size, b_tile=256):
    """pixel_values: NCHW float32 [B, C, H, W] -> logits [B, num_classes]."""
    B, C, H, W = pixel_values.shape
    P = patch_size
    assert H % P == 0 and W % P == 0
    nh, nw = H // P, W // P
    Dp = C * P * P

    # Mean-pool over patches in the WRAPPER, in f32 (faster and slightly more
    # accurate than pooling bf16 inside the kernel).  Row-major over (C, P, P),
    # matching Conv2d(stride=P) patch flattening.
    pooled = pixel_values.reshape(B, C, nh, P, nw, P).mean(axis=(2, 4))
    pooled = pooled.reshape(B, Dp)                                  # [B, Dp] f32

    w_emb, b_emb, ln_g, ln_b, w_proj, w_cls, b_cls = params
    hidden = w_emb.shape[1]
    num_classes = w_cls.shape[1]

    # Fuse visual projection + classifier (no nonlinearity between them).
    w_fused = jnp.dot(w_proj, w_cls, preferred_element_type=jnp.float32)

    # Lane-dense / tile-aligned padding.
    Dp_p = _round_up(Dp, 128)
    H_p = _round_up(hidden, 128)
    C_p = _round_up(num_classes, 128)

    # Batch tile: multiple of 8, clamped to the batch; prefer >= 2 grid steps so
    # both v7x TensorCores get work when the batch is large enough.
    b_tile = max(8, min(b_tile, _round_up(B, 8)))
    if B > 8 and _round_up(B, b_tile) // b_tile < 2:
        b_tile = _round_up((B + 1) // 2, 8)
    B_p = _round_up(B, b_tile)
    n_steps = B_p // b_tile

    pooled_p = jnp.pad(pooled, ((0, B_p - B), (0, Dp_p - Dp))).astype(jnp.bfloat16)
    w_emb_p = jnp.pad(w_emb, ((0, Dp_p - Dp), (0, H_p - hidden))).astype(jnp.bfloat16)
    b_emb_p = jnp.pad(b_emb, ((0, 0), (0, H_p - hidden))).astype(jnp.float32)
    ln_g_p = jnp.pad(ln_g, ((0, 0), (0, H_p - hidden))).astype(jnp.float32)
    ln_b_p = jnp.pad(ln_b, ((0, 0), (0, H_p - hidden))).astype(jnp.float32)
    w_fused_p = jnp.pad(w_fused, ((0, H_p - hidden), (0, C_p - num_classes))).astype(jnp.bfloat16)
    b_cls_p = jnp.pad(b_cls, ((0, 0), (0, C_p - num_classes))).astype(jnp.float32)

    # Explicit VMEM budget (block sizes x pipelining depth, generous 2x headroom),
    # capped well under v7x's 64 MiB physical VMEM.
    vmem_need = (
        2 * b_tile * Dp_p * 2                 # pooled input blocks, double-buffered, bf16
        + 2 * b_tile * C_p * 4                # output blocks, double-buffered, f32
        + 2 * (Dp_p * H_p + H_p * C_p) * 2    # weight matrices, bf16
        + 2 * (3 * H_p + C_p) * 4             # bias / LN rows, f32
    )
    vmem_limit = int(min(48 * 1024 * 1024, max(4 * 1024 * 1024, 2 * vmem_need)))

    cost = pl.CostEstimate(
        flops=2 * B_p * Dp_p * H_p + 2 * B_p * H_p * C_p,
        transcendentals=B_p,
        bytes_accessed=(B_p * Dp_p * 2 + Dp_p * H_p * 2 + H_p * C_p * 2
                        + 4 * H_p * 4 + C_p * 4 + B_p * C_p * 4),
    )

    kernel = functools.partial(clip_ft_kernel, h_true=hidden, h_pad=H_p)

    out = pl.pallas_call(
        kernel,
        out_shape=jax.ShapeDtypeStruct((B_p, C_p), jnp.float32),
        grid=(n_steps,),
        in_specs=[
            # Batch-streamed pooled patches (double-buffered DMA across grid steps).
            pl.BlockSpec((b_tile, Dp_p), lambda i: (i, 0)),
            # Weights / params: constant block index -> fetched once, VMEM-resident.
            pl.BlockSpec((Dp_p, H_p), lambda i: (0, 0)),
            pl.BlockSpec((1, H_p), lambda i: (0, 0)),
            pl.BlockSpec((1, H_p), lambda i: (0, 0)),
            pl.BlockSpec((1, H_p), lambda i: (0, 0)),
            pl.BlockSpec((H_p, C_p), lambda i: (0, 0)),
            pl.BlockSpec((1, C_p), lambda i: (0, 0)),
        ],
        out_specs=pl.BlockSpec((b_tile, C_p), lambda i: (i, 0)),
        compiler_params=pltpu.CompilerParams(
            dimension_semantics=("parallel",),
            vmem_limit_bytes=vmem_limit,
        ),
        cost_estimate=cost,
    )(pooled_p, w_emb_p, b_emb_p, ln_g_p, ln_b_p, w_fused_p, b_cls_p)

    return out[:B, :num_classes]


def init_params(key, c, patch_size, hidden, embed_dim, num_classes):
    dp = c * patch_size * patch_size
    ks = jax.random.split(key, 5)
    w_emb = jax.random.normal(ks[0], (dp, hidden), jnp.float32) * 0.02
    b_emb = jnp.zeros((1, hidden), jnp.float32)
    ln_g = jnp.ones((1, hidden), jnp.float32)
    ln_b = jnp.zeros((1, hidden), jnp.float32)
    w_proj = jax.random.normal(ks[1], (hidden, embed_dim), jnp.float32) * 0.02
    w_cls = jax.random.normal(ks[2], (embed_dim, num_classes), jnp.float32) * 0.02
    b_cls = jax.random.normal(ks[3], (1, num_classes), jnp.float32) * 0.02
    return (w_emb, b_emb, ln_g, ln_b, w_proj, w_cls, b_cls)


if __name__ == "__main__":
    # Small shapes consistent with the forward: NCHW image batch, 8 animal classes.
    B, C, H, W = 2, 3, 16, 16
    PATCH = 8
    HIDDEN = 32       # synthetic vision-tower width (padded to 128 in the wrapper)
    EMBED_DIM = 32    # CLIP image-feature dim (fused away with the classifier)
    NUM_CLASSES = 8   # len(train_dataset.classes) for the 8-animal folder

    key = jax.random.PRNGKey(0)
    k_x, k_p = jax.random.split(key)
    pixel_values = jax.random.normal(k_x, (B, C, H, W), jnp.float32)
    params = init_params(k_p, C, PATCH, HIDDEN, EMBED_DIM, NUM_CLASSES)

    logits = clip_finetuner_forward(pixel_values, params, PATCH)
    jax.block_until_ready(logits)
    assert logits.shape == (B, NUM_CLASSES)
    assert bool(jnp.all(jnp.isfinite(logits)))
    print("KERNEL_OK")
</pallas_src>

<mosaic_0001>
module attributes {stable_mosaic.version = 11 : i64} {
  func.func @clip_ft_kernel(%arg0: i32, %arg1: memref<8x256xbf16, #tpu.memory_space<vmem>>, %arg2: memref<256x128xbf16, #tpu.memory_space<vmem>>, %arg3: memref<1x128xf32, #tpu.memory_space<vmem>>, %arg4: memref<1x128xf32, #tpu.memory_space<vmem>>, %arg5: memref<1x128xf32, #tpu.memory_space<vmem>>, %arg6: memref<128x128xbf16, #tpu.memory_space<vmem>>, %arg7: memref<1x128xf32, #tpu.memory_space<vmem>>, %arg8: memref<8x128xf32, #tpu.memory_space<vmem>>) attributes {dimension_semantics = [#tpu.dimension_semantics<parallel>], iteration_bounds = array<i64: 1>, scalar_prefetch = 0 : i64, scratch_operands = 0 : i64, tpu.core_type = #tpu.core_type<tc>, window_params = [{transform_indices = @transform_0, window_bounds = array<i64: 8, 256>}, {pipeline_mode = #tpu.pipeline_mode<synchronous>, transform_indices = @transform_1, window_bounds = array<i64: 256, 128>}, {pipeline_mode = #tpu.pipeline_mode<synchronous>, transform_indices = @transform_2, window_bounds = array<i64: 1, 128>}, {pipeline_mode = #tpu.pipeline_mode<synchronous>, transform_indices = @transform_3, window_bounds = array<i64: 1, 128>}, {pipeline_mode = #tpu.pipeline_mode<synchronous>, transform_indices = @transform_4, window_bounds = array<i64: 1, 128>}, {pipeline_mode = #tpu.pipeline_mode<synchronous>, transform_indices = @transform_5, window_bounds = array<i64: 128, 128>}, {pipeline_mode = #tpu.pipeline_mode<synchronous>, transform_indices = @transform_6, window_bounds = array<i64: 1, 128>}, {transform_indices = @transform_7, window_bounds = array<i64: 8, 128>}]} {
    %c0 = arith.constant 0 : index
    %c0_0 = arith.constant 0 : index
    %0 = vector.load %arg1[%c0, %c0_0] : memref<8x256xbf16, #tpu.memory_space<vmem>>, vector<8x256xbf16>
    %c0_1 = arith.constant 0 : index
    %c0_2 = arith.constant 0 : index
    %1 = vector.load %arg2[%c0_1, %c0_2] : memref<256x128xbf16, #tpu.memory_space<vmem>>, vector<256x128xbf16>
    %cst = arith.constant dense<0.000000e+00> : vector<8x128xf32>
    %2 = tpu.matmul %0, %1, %cst {dimension_numbers = #tpu.dot_dimension_numbers<[1], [0], [0], [1], [0, 0, 1, 1], [], []>} : vector<8x256xbf16>, vector<256x128xbf16>, vector<8x128xf32> -> vector<8x128xf32>
    %c0_3 = arith.constant 0 : index
    %c0_4 = arith.constant 0 : index
    %3 = vector.load %arg3[%c0_3, %c0_4] : memref<1x128xf32, #tpu.memory_space<vmem>>, vector<1x128xf32>
    %4 = vector.broadcast %3 : vector<1x128xf32> to vector<8x128xf32>
    %5 = arith.addf %2, %4 : vector<8x128xf32>
    %cst_5 = arith.constant dense<0.000000e+00> : vector<8xf32>
    %6 = vector.multi_reduction <add>, %5, %cst_5 [1] : vector<8x128xf32> to vector<8xf32>
    %7 = vector.shape_cast %6 : vector<8xf32> to vector<8x1xf32>
    %cst_6 = arith.constant 3.125000e-02 : f32
    %8 = vector.broadcast %cst_6 : f32 to vector<8x1xf32>
    %9 = arith.mulf %7, %8 : vector<8x1xf32>
    %10 = vector.broadcast %9 : vector<8x1xf32> to vector<8x128xf32>
    %11 = arith.subf %5, %10 : vector<8x128xf32>
    %12 = arith.mulf %11, %11 : vector<8x128xf32>
    %cst_7 = arith.constant dense<0.000000e+00> : vector<8xf32>
    %13 = vector.multi_reduction <add>, %12, %cst_7 [1] : vector<8x128xf32> to vector<8xf32>
    %14 = vector.shape_cast %13 : vector<8xf32> to vector<8x1xf32>
    %cst_8 = arith.constant 9.600000e+01 : f32
    %15 = vector.broadcast %cst_8 : f32 to vector<8x1xf32>
    %16 = arith.mulf %15, %9 : vector<8x1xf32>
    %17 = arith.mulf %16, %9 : vector<8x1xf32>
    %18 = arith.subf %14, %17 : vector<8x1xf32>
    %cst_9 = arith.constant 3.125000e-02 : f32
    %19 = vector.broadcast %cst_9 : f32 to vector<8x1xf32>
    %20 = arith.mulf %18, %19 : vector<8x1xf32>
    %cst_10 = arith.constant 0.000000e+00 : f32
    %21 = vector.broadcast %cst_10 : f32 to vector<8x1xf32>
    %22 = arith.maximumf %20, %21 : vector<8x1xf32>
    %cst_11 = arith.constant 9.99999974E-6 : f32
    %23 = vector.broadcast %cst_11 : f32 to vector<8x1xf32>
    %24 = arith.addf %22, %23 : vector<8x1xf32>
    %25 = math.rsqrt %24 : vector<8x1xf32>
    %26 = vector.broadcast %25 : vector<8x1xf32> to vector<8x128xf32>
    %27 = arith.mulf %11, %26 : vector<8x128xf32>
    %c0_12 = arith.constant 0 : index
    %c0_13 = arith.constant 0 : index
    %28 = vector.load %arg4[%c0_12, %c0_13] : memref<1x128xf32, #tpu.memory_space<vmem>>, vector<1x128xf32>
    %29 = vector.broadcast %28 : vector<1x128xf32> to vector<8x128xf32>
    %30 = arith.mulf %27, %29 : vector<8x128xf32>
    %c0_14 = arith.constant 0 : index
    %c0_15 = arith.constant 0 : index
    %31 = vector.load %arg5[%c0_14, %c0_15] : memref<1x128xf32, #tpu.memory_space<vmem>>, vector<1x128xf32>
    %32 = vector.broadcast %31 : vector<1x128xf32> to vector<8x128xf32>
    %33 = arith.addf %30, %32 : vector<8x128xf32>
    %34 = arith.truncf %33 : vector<8x128xf32> to vector<8x128xbf16>
    %c0_16 = arith.constant 0 : index
    %c0_17 = arith.constant 0 : index
    %35 = vector.load %arg6[%c0_16, %c0_17] : memref<128x128xbf16, #tpu.memory_space<vmem>>, vector<128x128xbf16>
    %cst_18 = arith.constant dense<0.000000e+00> : vector<8x128xf32>
    %36 = tpu.matmul %34, %35, %cst_18 {dimension_numbers = #tpu.dot_dimension_numbers<[1], [0], [0], [1], [0, 0, 1, 1], [], []>} : vector<8x128xbf16>, vector<128x128xbf16>, vector<8x128xf32> -> vector<8x128xf32>
    %c0_19 = arith.constant 0 : index
    %c0_20 = arith.constant 0 : index
    %37 = vector.load %arg7[%c0_19, %c0_20] : memref<1x128xf32, #tpu.memory_space<vmem>>, vector<1x128xf32>
    %38 = vector.broadcast %37 : vector<1x128xf32> to vector<8x128xf32>
    %39 = arith.addf %36, %38 : vector<8x128xf32>
    %c0_21 = arith.constant 0 : index
    %c0_22 = arith.constant 0 : index
    %40 = vector.load %arg8[%c0_21, %c0_22] : memref<8x128xf32, #tpu.memory_space<vmem>>, vector<8x128xf32>
    tpu.vector_store %arg8[%c0_21, %c0_22], %39 {strides = array<i32>} : memref<8x128xf32, #tpu.memory_space<vmem>>, vector<8x128xf32>,
    return
  }
  func.func @transform_0(%arg0: i32) -> (i32, i32) {
    %c0_i32 = arith.constant 0 : i32
    %c0_i32_0 = arith.constant 0 : i32
    return %arg0, %c0_i32 : i32, i32
  }
  func.func @transform_1(%arg0: i32) -> (i32, i32) {
    %c0_i32 = arith.constant 0 : i32
    %c0_i32_0 = arith.constant 0 : i32
    %c0_i32_1 = arith.constant 0 : i32
    return %c0_i32, %c0_i32_0 : i32, i32
  }
  func.func @transform_2(%arg0: i32) -> (i32, i32) {
    %c0_i32 = arith.constant 0 : i32
    %c0_i32_0 = arith.constant 0 : i32
    %c0_i32_1 = arith.constant 0 : i32
    return %c0_i32, %c0_i32_0 : i32, i32
  }
  func.func @transform_3(%arg0: i32) -> (i32, i32) {
    %c0_i32 = arith.constant 0 : i32
    %c0_i32_0 = arith.constant 0 : i32
    %c0_i32_1 = arith.constant 0 : i32
    return %c0_i32, %c0_i32_0 : i32, i32
  }
  func.func @transform_4(%arg0: i32) -> (i32, i32) {
    %c0_i32 = arith.constant 0 : i32
    %c0_i32_0 = arith.constant 0 : i32
    %c0_i32_1 = arith.constant 0 : i32
    return %c0_i32, %c0_i32_0 : i32, i32
  }
  func.func @transform_5(%arg0: i32) -> (i32, i32) {
    %c0_i32 = arith.constant 0 : i32
    %c0_i32_0 = arith.constant 0 : i32
    %c0_i32_1 = arith.constant 0 : i32
    return %c0_i32, %c0_i32_0 : i32, i32
  }
  func.func @transform_6(%arg0: i32) -> (i32, i32) {
    %c0_i32 = arith.constant 0 : i32
    %c0_i32_0 = arith.constant 0 : i32
    %c0_i32_1 = arith.constant 0 : i32
    return %c0_i32, %c0_i32_0 : i32, i32
  }
  func.func @transform_7(%arg0: i32) -> (i32, i32) {
    %c0_i32 = arith.constant 0 : i32
    %c0_i32_0 = arith.constant 0 : i32
    return %arg0, %c0_i32 : i32, i32
  }
}

</mosaic_0001>

<bundles_post_ra>
// kernel: tpu_custom_call.1
= control target key start
LH: loop header
LB: loop body
LE: loop exit
PB: predicated region body
PF: predicated region fallthrough
CT: control target
= control target key end

     0   :  { %12 = vsyncpa [#allocation3], 0  ;;  %s735_s0 = inlined_call_operand.hbm [shape: bf16[8,256], index: 0, kind: input, shape index: {}]   ;;  %s736_s1 = inlined_call_operand.hbm [shape: bf16[256,128], index: 1, kind: input, shape index: {}]   ;;  %s737_s2 = inlined_call_operand.vmem [shape: f32[1,128], index: 2, kind: input, shape index: {}]   ;;  %s738_s3 = inlined_call_operand.vmem [shape: f32[1,128], index: 3, kind: input, shape index: {}]   ;;  %s739_s4 = inlined_call_operand.vmem [shape: f32[1,128], index: 4, kind: input, shape index: {}]   ;;  %s740_s5 = inlined_call_operand.hbm [shape: bf16[128,128], index: 5, kind: input, shape index: {}]   ;;  %s741_s6 = inlined_call_operand.vmem [shape: f32[1,128], index: 6, kind: input, shape index: {}]   ;;  %s742_s7 = inlined_call_operand.hbm [shape: f32[8,128], index: 7, kind: output, shape index: {}]  }
   0x1   :  { %13 = vsyncpa [#allocation6], 0 }
   0x2   :  { %14 = vsyncpa [#allocation4], 0  ;;  %s621_s24 = smov [#allocation5]   ;;  %s527_s28 = scalar_lea.hbm %s736_s1, 2048 }
   0x3   :  { %s30_s25 = sshll.u32 %s621_s24, 4  ;;  %p528_p0 = scmp.ne.s32.totalorder %s736_s1, %s527_s28  ;;  %s31_s25 = int_to_ptr.vmem [resolvable:$true] %s30_s25 }
   0x4   :  { %p531_p1 = scmp.lt.u32.totalorder %s527_s28, %s736_s1 }
   0x6   :  { %p533_p2 = pnand %p531_p1, %p528_p0 }
   0x8   :  { %536 = shalt.err (!%p533_p2)
}
   0x9   :  { %s537_s10 = scalar_lea.vmem %s31_s25, 2048  ;;  %p542_p4 = scmp.lt.s32.totalorder %s31_s25, %s31_s25 }
   0xa   :  { %p538_p3 = scmp.ne.s32.totalorder %s31_s25, %s537_s10  ;;  %p543_p5 = scmp.lt.s32.totalorder %s537_s10, %s537_s10 }
   0xc   :  { %p544_p6 = por %p543_p5, %p542_p4 }
   0xe   :  { %p545_p7 = pnand %p544_p6, %p538_p3 }
  0x10   :  { %548 = shalt.err (!%p545_p7)
}
  0x11   :  { %s622_s11 = smov 64   ;;  %s623_s12 = smov 4  }
  0x12   :  { %36 = dma.hbm_to_vmem [thread:$0]  %s736_s1, 2048, %s31_s25, [#allocation6], %s622_s11, %s622_s11, %s623_s12  }
  0x13   :  { %s624_s15 = smov [#allocation2]   ;;  %s625_s17 = smov [#allocation7]  }
  0x14   :  { %s21_s16 = sshll.u32 %s624_s15, 4  ;;  %s48_s18 = sshll.u32 %s625_s17, 4  ;;  %s22_s16 = int_to_ptr.vmem [resolvable:$true] %s21_s16  ;;  %s49_s18 = int_to_ptr.vmem [resolvable:$true] %s48_s18 }
  0x15   :  { %s549_s21 = scalar_lea.hbm %s735_s0, 128 }
  0x16   :  { %p550_p8 = scmp.ne.s32.totalorder %s735_s0, %s549_s21  ;;  %p553_p9 = scmp.lt.u32.totalorder %s549_s21, %s735_s0 }
  0x18   :  { %p555_p10 = pnand %p553_p9, %p550_p8 }
  0x1a   :  { %558 = shalt.err (!%p555_p10)
}
  0x1b   :  { %s559_s1 = scalar_lea.vmem %s22_s16, 128  ;;  %p564_p12 = scmp.lt.s32.totalorder %s22_s16, %s22_s16 }
  0x1c   :  { %p560_p11 = scmp.ne.s32.totalorder %s22_s16, %s559_s1  ;;  %p565_p13 = scmp.lt.s32.totalorder %s559_s1, %s559_s1 }
  0x1e   :  { %p566_p0 = por %p565_p13, %p564_p12 }
  0x20   :  { %p567_p1 = pnand %p566_p0, %p560_p11 }
  0x22   :  { %570 = shalt.err (!%p567_p1)
}
  0x23   :  { %24 = dma.hbm_to_vmem [thread:$0]  %s735_s0, 128, %s22_s16, [#allocation3]  }
  0x24   :  { %s571_s30 = scalar_lea.hbm %s740_s5, 1024 }
  0x25   :  { %p572_p2 = scmp.ne.s32.totalorder %s740_s5, %s571_s30  ;;  %p575_p3 = scmp.lt.u32.totalorder %s571_s30, %s740_s5 }
  0x27   :  { %p577_p4 = pnand %p575_p3, %p572_p2 }
  0x29   :  { %580 = shalt.err (!%p577_p4)
}
  0x2a   :  { %s581_s14 = scalar_lea.vmem %s49_s18, 1024  ;;  %p586_p6 = scmp.lt.s32.totalorder %s49_s18, %s49_s18 }
  0x2b   :  { %p582_p5 = scmp.ne.s32.totalorder %s49_s18, %s581_s14  ;;  %p587_p7 = scmp.lt.s32.totalorder %s581_s14, %s581_s14 }
  0x2d   :  { %p588_p8 = por %p587_p7, %p586_p6 }
  0x2f   :  { %p589_p9 = pnand %p588_p8, %p582_p5 }
  0x31   :  { %592 = shalt.err (!%p589_p9)
}
  0x32   :  { %54 = dma.hbm_to_vmem [thread:$0]  %s740_s5, 1024, %s49_s18, [#allocation6], %s622_s11, %s622_s11, %s623_s12  }
  0x33   :  { %615 = dma.done.wait [#allocation3], 128  }
  0x34   :  { %616 = vsyncadd [#allocation3], 4294967168 }
  0x35   :  { %617 = dma.done.wait [#allocation6], 3072  }
  0x36   :  { %618 = vsyncadd [#allocation6], 4294964224  ;;  %v499_v0 = vld [vmem:[#allocation5 + $0x40] sm:$0xff]   ;;  %v501_v2 = vld [vmem:[#allocation5 + $0x48] sm:$0xff]   ;;  %v626_v27 = vmov 0.0   ;;  %vm627_vm0 = vmmov 0  }
  0x37   :  { %v500_v1 = vld [vmem:[#allocation5] sm:$0xff]   ;;  %440 = vmatprep.subr.bf16.mxu0 %v499_v0  ;;  %v502_v3 = vld [vmem:[#allocation5 + $0x8] sm:$0xff]   ;;  %v503_v4 = vld [vmem:[#allocation5 + $0x50] sm:$0xff]   ;;  %471 = vmatprep.subr.bf16.mxu1 %v626_v27  ;;  %s628_s20 = smov [#allocation8]  }
  0x38   :  { %441 = vmatpush3.bf16.msra.mxu0 %v500_v1  ;;  %v504_v5 = vld [vmem:[#allocation5 + $0x10] sm:$0xff]   ;;  %v505_v6 = vld [vmem:[#allocation5 + $0x58] sm:$0xff]   ;;  %v507_v8 = vld [vmem:[#allocation5 + $0x60] sm:$0xff]   ;;  %487 = vmatprep.mubr.msk.bf16.mxu1 %vm627_vm0, %v626_v27  ;;  %s400_s21 = sshll.u32 %s628_s20, 4  ;;  %s401_s21 = int_to_ptr.vmem [resolvable:$true] %s400_s21 }
  0x39   :  { %442 = vmatprep.subr.bf16.mxu0 %v501_v2  ;;  %v506_v7 = vld [vmem:[#allocation5 + $0x18] sm:$0xff]   ;;  %v508_v9 = vld [vmem:[#allocation5 + $0x20] sm:$0xff]   ;;  %v509_v10 = vld [vmem:[#allocation5 + $0x68] sm:$0xff]   ;;  %p598_p11 = scmp.lt.s32.totalorder %s401_s21, %s401_s21 }
  0x3a   :  { %v67_v11 = vld [vmem:[#allocation2] sm:$0xff]  ;;  %v510_v12 = vld [vmem:[#allocation5 + $0x28] sm:$0xff]   ;;  %v511_v14 = vld [vmem:[#allocation5 + $0x70] sm:$0xff]  }
  0x3b   :  { %v412_v13 = vcombine.high %v67_v11, %v67_v11  ;;  %v512_v15 = vld [vmem:[#allocation5 + $0x30] sm:$0xff]   ;;  %v513_v16 = vld [vmem:[#allocation5 + $0x78] sm:$0xff]   ;;  %v411_v18 = vcombine.low %v67_v11, %v67_v11  ;;  %v517_v26 = vld [vmem:[#allocation7] sm:$0xff]  }
  0x3c   :  { %443 = vmatpush3.bf16.msra.mxu0 %v502_v3  ;;  %v514_v17 = vld [vmem:[#allocation5 + $0x38] sm:$0xff]   ;;  %472 = vmatpush3.bf16.msra.mxu1 %v517_v26  ;;  %v518_v32 = vld [vmem:[#allocation7 + $0x8] sm:$0xff]   ;;  %v519_v33 = vld [vmem:[#allocation7 + $0x10] sm:$0xff]  }
  0x3d   :  { %444 = vmatprep.subr.bf16.mxu0 %v503_v4  ;;  %242 = vmatprep.mubr.bf16.mxu0 %v412_v13  ;;  %v410_v21 = vld [vmem:[%s737_s2] ss:$0 sm:$0xff]  ;;  %v521_v35 = vld [vmem:[#allocation7 + $0x20] sm:$0xff]   ;;  %v522_v36 = vld [vmem:[#allocation7 + $0x28] sm:$0xff]  }
  0x3e   :  { %473 = vmatprep.subr.bf16.mxu1 %v626_v27  ;;  %v520_v34 = vld [vmem:[#allocation7 + $0x18] sm:$0xff]   ;;  %v523_v37 = vld [vmem:[#allocation7 + $0x30] sm:$0xff]  }
  0x3f   :  { %v524_v38 = vld [vmem:[#allocation7 + $0x38] sm:$0xff]  }
  0x40   :  { %445 = vmatpush3.bf16.msra.mxu0 %v504_v5  ;;  %474 = vmatpush3.bf16.msra.mxu1 %v518_v32  ;;  %v429_v47 = vld [vmem:[%s738_s3] ss:$0 sm:$0xff]  ;;  %s593_s3 = scalar_lea.vmem %s401_s21, 128 }
  0x41   :  { %446 = vmatprep.subr.bf16.mxu0 %v505_v6  ;;  %475 = vmatprep.subr.bf16.mxu1 %v626_v27  ;;  %v430_v49 = vld [vmem:[%s739_s4] ss:$0 sm:$0xff]  ;;  %p594_p10 = scmp.ne.s32.totalorder %s401_s21, %s593_s3  ;;  %p599_p12 = scmp.lt.s32.totalorder %s593_s3, %s593_s3 }
  0x42   :  { %v431_v53 = vld [vmem:[%s741_s6] ss:$0 sm:$0xff] }
  0x43   :  { %p600_p13 = por %p599_p12, %p598_p11 }
  0x44   :  { %447 = vmatpush3.bf16.msra.mxu0 %v506_v7  ;;  %476 = vmatpush3.bf16.msra.mxu1 %v519_v33 }
  0x45   :  { %448 = vmatprep.subr.bf16.mxu0 %v507_v8  ;;  %477 = vmatprep.subr.bf16.mxu1 %v626_v27  ;;  %p601_p0 = pnand %p600_p13, %p594_p10 }
  0x48   :  { %449 = vmatpush3.bf16.msra.mxu0 %v508_v9  ;;  %478 = vmatpush3.bf16.msra.mxu1 %v520_v34 }
  0x49   :  { %450 = vmatprep.subr.bf16.mxu0 %v509_v10  ;;  %479 = vmatprep.subr.bf16.mxu1 %v626_v27 }
  0x4c   :  { %451 = vmatpush3.bf16.msra.mxu0 %v510_v12  ;;  %480 = vmatpush3.bf16.msra.mxu1 %v521_v35 }
  0x4d   :  { %452 = vmatprep.subr.bf16.mxu0 %v511_v14  ;;  %481 = vmatprep.subr.bf16.mxu1 %v626_v27 }
  0x50   :  { %453 = vmatpush3.bf16.msra.mxu0 %v512_v15  ;;  %482 = vmatpush3.bf16.msra.mxu1 %v522_v36 }
  0x51   :  { %454 = vmatprep.subr.bf16.mxu0 %v513_v16  ;;  %483 = vmatprep.subr.bf16.mxu1 %v626_v27 }
  0x54   :  { %455 = vmatpush3.bf16.msra.mxu0 %v514_v17  ;;  %484 = vmatpush3.bf16.msra.mxu1 %v523_v37 }
  0x55   :  { %485 = vmatprep.subr.bf16.mxu1 %v626_v27 }
  0x57   :  { %243 = vmatmul.mubr.bf16.vlgmr.msra.gmra.mrb[0].mxu0 %v411_v18 }
  0x58   :  { %486 = vmatpush3.bf16.msra.mxu1 %v524_v38 }
 0x12a   :  { %v456_v19 = vpop.f32.mrb[0].mxu0 }
 0x12b   :  { %v457_v20 = vpop.f32.mrb[1].mxu0 }
 0x12c   :  { %v458_v22 = vadd.f32 %v457_v20, %v456_v19  ;;  %v459_v23 = vpop.f32.mrb[2].mxu0 }
 0x12d   :  { %v460_v24 = vpop.f32.mrb[3].mxu0 }
 0x12e   :  { %v245_v25 = vadd.f32 %v458_v22, %v410_v21 }
 0x130   :  { %250 = vadd.xlane.f32.xlu0 %v245_v25 }
 0x1bd   :  { %v251_v28 = vpop.xlane.xlu0 %250 }
 0x1be   :  { %v252_v29 = vmul.f32 0.03125, %v251_v28 }
 0x1c0   :  { %v253_v30 = vsub.f32 %v245_v25, %v252_v29  ;;  %v257_v39 = vmul.f32 96.0, %v252_v29 }
 0x1c2   :  { %v254_v31 = vmul.f32 %v253_v30, %v253_v30  ;;  %v258_v40 = vmul.f32 %v257_v39, %v252_v29 }
 0x1c4   :  { %255 = vadd.xlane.f32.xlu0 %v254_v31 }
 0x251   :  { %v256_v41 = vpop.xlane.xlu0 %255 }
 0x252   :  { %v259_v42 = vsub.f32 %v256_v41, %v258_v40 }
 0x254   :  { %v260_v43 = vmul.f32 0.03125, %v259_v42 }
 0x256   :  { %v261_v44 = vmax.f32 %v260_v43, 0.0 }
 0x258   :  { %v262_v45 = vadd.f32 1e-05, %v261_v44 }
 0x25a   :  { %525 = vrsqrt.f32 %v262_v45 }
 0x264   :  { %v526_v46 = vpop.eup %525 }
 0x265   :  { %v264_v48 = vmul.f32 %v526_v46, %v253_v30 }
 0x267   :  { %v272_v50 = vmul.f32 %v429_v47, %v264_v48 }
 0x269   :  { %v280_v51 = vadd.f32 %v430_v49, %v272_v50 }
 0x26b   :  { %v281_v52 = vpack.c.bf16 %v280_v51, %v280_v51 }
 0x26d   :  { %488 = vmatmul.mubr.bf16.vlgmr.msra.gmra.mrb[0].mxu1 %v281_v52 }
 0x340   :  { %v387_v54 = vpop.f32.mrb[0].mxu1 }
 0x341   :  { %v388_v55 = vadd.f32 %v431_v53, %v387_v54  ;;  %v489_v56 = vpop.f32.mrb[1].mxu1 }
 0x342   :  { %v390_v57 = vpop.f32.mrb[2].mxu1 }
 0x343   :  { %393 = vst [vmem:[#allocation8] sm:$0xff] %v388_v55  ;;  %v490_v58 = vpop.f32.mrb[3].mxu1 }
 0x344   :  { %604 = shalt.err (!%p601_p0)
}
 0x345   :  { %s605_s6 = scalar_lea.hbm %s742_s7, 128 }
 0x346   :  { %p606_p1 = scmp.ne.s32.totalorder %s742_s7, %s605_s6  ;;  %p609_p2 = scmp.lt.u32.totalorder %s605_s6, %s742_s7 }
 0x348   :  { %p611_p3 = pnand %p609_p2, %p606_p1 }
 0x34a   :  { %614 = shalt.err (!%p611_p3)
}
 0x34b   :  { %403 = dma.vmem_to_hbm [thread:$0]  %s401_s21, 128, %s742_s7, [#allocation4]  }
 0x34c   :  { %619 = dma.done.wait [#allocation4], 128  }
 0x34d   :  { %620 = vsyncadd [#allocation4], 4294967168 }
 0x34e   :  { %407 = vsyncpa [#allocation3], 1 }
 0x34f   :  { %408 = vsyncpa [#allocation6], 1 }
 0x350   :  { %409 = vsyncpa [#allocation4], 1 }

</bundles_post_ra>
